<compile_context>
chip_gen: v7x
topology: tpu7x:2x2x1
jax: 0.10.0
libtpu: 0.0.40
codegen_flags: <defaults>
</compile_context>

<pallas_src>
import jax
import jax.numpy as jnp
from jax.experimental import pallas as pl
from jax.experimental.pallas import tpu as pltpu


def _round_up(x, m):
    return (x + m - 1) // m * m


def _pick_tk(kp, tk_cap):
    """Largest multiple of 128 that divides kp and is <= tk_cap (>=128)."""
    tk_cap = max(128, (tk_cap // 128) * 128)
    best, t, limit = 128, 128, min(kp, tk_cap)
    while t <= limit:
        if kp % t == 0:
            best = t
        t += 128
    return best


def clip_classifier_kernel(
    x_ref,      # [TB, TK]   bf16  streamed flattened-image tile
    wb_ref,     # [TK, Fp]   bf16  streamed backbone-projection tile
    bb_ref,     # [1, Fp]    f32   resident (backbone bias)
    wh_ref,     # [Fp, 256]  bf16  resident (model.head)
    bh_ref,     # [1, 256]   f32   resident
    w1_ref,     # [256, 128] bf16  resident (fully_connect[0])
    b1_ref,     # [1, 128]   f32   resident
    w2_ref,     # [128, Np]  bf16  resident (fully_connect[2])
    b2_ref,     # [1, Np]    f32   resident
    o_ref,      # [TB, Np]   f32   output (resident across K)
    acc_ref,    # [TB, Fp]   f32   scratch accumulator
):
    k = pl.program_id(1)

    @pl.when(k == 0)
    def _():
        acc_ref[...] = jnp.zeros_like(acc_ref)

    # Steady state: one bf16 MXU matmul + f32 accumulate per K chunk.
    acc_ref[...] += jnp.dot(
        x_ref[...], wb_ref[...], preferred_element_type=jnp.float32
    )

    # Epilogue: tiny layers (<0.1% of FLOPs), run once on the last K step.
    @pl.when(k == pl.num_programs(1) - 1)
    def _():
        feats = (acc_ref[...] + bb_ref[...]).astype(jnp.bfloat16)
        # model.head: Linear(num_features, 256)
        h = jnp.dot(feats, wh_ref[...], preferred_element_type=jnp.float32)
        h = h + bh_ref[...]
        # fully_connect: Linear(256,128) -> ReLU -> Linear(128, n_cls)
        h = jnp.dot(h.astype(jnp.bfloat16), w1_ref[...],
                    preferred_element_type=jnp.float32) + b1_ref[...]
        h = jnp.maximum(h, 0.0)
        out = jnp.dot(h.astype(jnp.bfloat16), w2_ref[...],
                      preferred_element_type=jnp.float32) + b2_ref[...]
        o_ref[...] = out.astype(o_ref.dtype)


def prepare_params(params, d_in, *, tk_cap=2048, feature_pad=128):
    """One-time pad + bf16 cast of weights into MXU/lane-friendly layouts.

    Call ONCE (outside the per-step forward): under jit these pads/casts would
    otherwise cost a full HBM pass over the largest weight every call.
    `params` are pre-transposed (in, out) Linear weights + (1, out) biases.
    """
    wb, bb, wh, bh, w1, b1, w2, b2 = params
    num_features = wb.shape[1]
    n_cls = w2.shape[1]

    kp = _round_up(d_in, 128)            # padded K (== d_in when 128-aligned)
    tk = _pick_tk(kp, tk_cap)            # multiple of 128, divides kp exactly
    fp = _round_up(num_features, feature_pad)   # lane-dense features
    np_ = _round_up(n_cls, 128)                 # lane-dense output

    wb_p = jnp.zeros((kp, fp), jnp.bfloat16).at[:d_in, :num_features].set(
        wb.astype(jnp.bfloat16))
    bb_p = jnp.zeros((1, fp), jnp.float32).at[:, :num_features].set(bb)
    wh_p = jnp.zeros((fp, 256), jnp.bfloat16).at[:num_features, :].set(
        wh.astype(jnp.bfloat16))
    bh_p = bh.astype(jnp.float32)
    w1_p = w1.astype(jnp.bfloat16)
    b1_p = b1.astype(jnp.float32)
    w2_p = jnp.zeros((128, np_), jnp.bfloat16).at[:, :n_cls].set(
        w2.astype(jnp.bfloat16))
    b2_p = jnp.zeros((1, np_), jnp.float32).at[:, :n_cls].set(b2)

    weights = (wb_p, bb_p, wh_p, bh_p, w1_p, b1_p, w2_p, b2_p)
    return dict(weights=weights, d_in=d_in, kp=kp, tk=tk, fp=fp,
                np_=np_, n_cls=n_cls)


def clip_classifier_forward(image, prepared, *, tb=None, batch_blocks=1,
                            wb_buffers=2):
    """image: NCHW float32 [B, C, H, W].  `prepared` from prepare_params().

    batch_blocks=1 (v5e/v6e, single TC: Wb read once) or 2 (v7x megacore).
    """
    B = image.shape[0]
    x_flat = image.reshape(B, -1)                 # NCHW row-major flatten
    d_in = prepared["d_in"]
    assert x_flat.shape[1] == d_in, (x_flat.shape, d_in)
    kp, tk = prepared["kp"], prepared["tk"]
    fp, np_, n_cls = prepared["fp"], prepared["np_"], prepared["n_cls"]
    wb_p, bb_p, wh_p, bh_p, w1_p, b1_p, w2_p, b2_p = prepared["weights"]

    # --- batch tiling: multiples of 16 (bf16 sublane packing), few big blocks.
    if tb is None:
        bp0 = _round_up(B, 16)
        tb = max(16, _round_up(pl.cdiv(bp0, max(1, batch_blocks)), 16))
    else:
        tb = max(16, _round_up(tb, 16))
    bp = _round_up(B, tb)                         # padded batch, multiple of tb

    # Activations: cast only; pad only when actually needed.
    x_p = x_flat.astype(jnp.bfloat16)
    if bp != B or kp != d_in:
        x_p = jnp.pad(x_p, ((0, bp - B), (0, kp - d_in)))

    grid = (bp // tb, kp // tk)

    # Streamed operands: x (per (i,k) tile) and Wb (per k tile).
    x_spec = pl.BlockSpec((tb, tk), lambda i, k: (i, k))
    if wb_buffers != 2:
        wb_spec = pl.BlockSpec((tk, fp), lambda i, k: (k, 0),
                               pipeline_mode=pl.Buffered(wb_buffers))
    else:
        wb_spec = pl.BlockSpec((tk, fp), lambda i, k: (k, 0))
    # Small resident operands: constant block index -> fetched once, stay in VMEM.
    res = lambda shape: pl.BlockSpec(shape, lambda i, k: (0, 0))
    out_spec = pl.BlockSpec((tb, np_), lambda i, k: (i, 0))

    resident_bytes = (bb_p.size * 4 + wh_p.size * 2 + bh_p.size * 4 +
                      w1_p.size * 2 + b1_p.size * 4 + w2_p.size * 2 +
                      b2_p.size * 4)
    cost = pl.CostEstimate(
        flops=2 * bp * kp * fp + 2 * bp * (fp * 256 + 256 * 128 + 128 * np_),
        transcendentals=0,
        bytes_accessed=(x_p.size * 2                       # activations (bf16)
                        + (bp // tb) * wb_p.size * 2       # Wb re-read per block
                        + resident_bytes
                        + bp * np_ * 4),                   # f32 output
    )

    out_padded = pl.pallas_call(
        clip_classifier_kernel,
        out_shape=jax.ShapeDtypeStruct((bp, np_), jnp.float32),
        grid=grid,
        in_specs=[
            x_spec,
            wb_spec,
            res((1, fp)),
            res((fp, 256)),
            res((1, 256)),
            res((256, 128)),
            res((1, 128)),
            res((128, np_)),
            res((1, np_)),
        ],
        out_specs=out_spec,
        scratch_shapes=[pltpu.VMEM((tb, fp), jnp.float32)],
        compiler_params=pltpu.CompilerParams(
            dimension_semantics=("parallel", "arbitrary"),
        ),
        cost_estimate=cost,
    )(x_p, wb_p, bb_p, wh_p, bh_p, w1_p, b1_p, w2_p, b2_p)

    return out_padded[:B, :n_cls]


def init_params(key, d_in, num_features=64, n_target_classes=7):
    """Deterministic parameter init.  Weights stored in (in, out) layout
    (i.e. already-transposed PyTorch Linear weights) plus (1, out) biases."""
    ks = jax.random.split(key, 8)

    def lin(kw, kb, fan_in, fan_out):
        bound = 1.0 / jnp.sqrt(fan_in)
        # PyTorch Linear weight is (out, in); keep that convention then transpose.
        w = jax.random.uniform(kw, (fan_out, fan_in), jnp.float32, -bound, bound)
        b = jax.random.uniform(kb, (fan_out,), jnp.float32, -bound, bound)
        return w.T, b.reshape(1, fan_out)

    wb, bb = lin(ks[0], ks[1], d_in, num_features)          # backbone stand-in
    wh, bh = lin(ks[2], ks[3], num_features, 256)           # model.head
    w1, b1 = lin(ks[4], ks[5], 256, 128)                    # fully_connect[0]
    w2, b2 = lin(ks[6], ks[7], 128, n_target_classes)       # fully_connect[2]
    return (wb, bb, wh, bh, w1, b1, w2, b2)


if __name__ == "__main__":
    key = jax.random.PRNGKey(0)
    k_img, k_par = jax.random.split(key)

    # Small shapes: batch=2, in_chans=3 (as in timm.create_model(..., in_chans=3)),
    # spatial=16, num_features=64, n_target_classes=7.
    B, C, H, W = 2, 3, 16, 16
    image = jax.random.normal(k_img, (B, C, H, W), jnp.float32)

    params = init_params(k_par, d_in=C * H * W, num_features=64,
                         n_target_classes=7)

    # One-time weight pad/cast; tk_cap=256 so D_in=768 exercises a 3-step
    # K-reduction grid (tk=256 divides 768 exactly -> no K padding of x).
    prepared = prepare_params(params, d_in=C * H * W, tk_cap=256)

    out = clip_classifier_forward(image, prepared, batch_blocks=1)
    out = jax.block_until_ready(out)

    # Pure-JAX reference mirroring the kernel's bf16-input / f32-accumulate math.
    wb, bb, wh, bh, w1, b1, w2, b2 = params
    f32 = jnp.float32
    bf = lambda a: a.astype(jnp.bfloat16).astype(f32)
    x_flat = image.reshape(B, -1)
    feats = bf(x_flat) @ bf(wb) + bb
    h = bf(feats) @ bf(wh) + bh
    h = bf(h) @ bf(w1) + b1
    h = jnp.maximum(h, 0.0)
    ref = bf(h) @ bf(w2) + b2

    assert out.shape == (B, 7)
    assert jnp.allclose(out, ref, atol=1e-2, rtol=1e-2)

    print("KERNEL_OK")
</pallas_src>

<mosaic_0001>
module attributes {stable_mosaic.version = 11 : i64} {
  func.func @clip_classifier_kernel(%arg0: i32, %arg1: i32, %arg2: memref<16x256xbf16, #tpu.memory_space<vmem>>, %arg3: memref<256x128xbf16, #tpu.memory_space<vmem>>, %arg4: memref<1x128xf32, #tpu.memory_space<vmem>>, %arg5: memref<128x256xbf16, #tpu.memory_space<vmem>>, %arg6: memref<1x256xf32, #tpu.memory_space<vmem>>, %arg7: memref<256x128xbf16, #tpu.memory_space<vmem>>, %arg8: memref<1x128xf32, #tpu.memory_space<vmem>>, %arg9: memref<128x128xbf16, #tpu.memory_space<vmem>>, %arg10: memref<1x128xf32, #tpu.memory_space<vmem>>, %arg11: memref<16x128xf32, #tpu.memory_space<vmem>>, %arg12: memref<16x128xf32, #tpu.memory_space<vmem>>) attributes {dimension_semantics = [#tpu.dimension_semantics<parallel>, #tpu.dimension_semantics<arbitrary>], iteration_bounds = array<i64: 1, 3>, scalar_prefetch = 0 : i64, scratch_operands = 1 : i64, tpu.core_type = #tpu.core_type<tc>, window_params = [{transform_indices = @transform_0, window_bounds = array<i64: 16, 256>}, {transform_indices = @transform_1, window_bounds = array<i64: 256, 128>}, {pipeline_mode = #tpu.pipeline_mode<synchronous>, transform_indices = @transform_2, window_bounds = array<i64: 1, 128>}, {pipeline_mode = #tpu.pipeline_mode<synchronous>, transform_indices = @transform_3, window_bounds = array<i64: 128, 256>}, {pipeline_mode = #tpu.pipeline_mode<synchronous>, transform_indices = @transform_4, window_bounds = array<i64: 1, 256>}, {pipeline_mode = #tpu.pipeline_mode<synchronous>, transform_indices = @transform_5, window_bounds = array<i64: 256, 128>}, {pipeline_mode = #tpu.pipeline_mode<synchronous>, transform_indices = @transform_6, window_bounds = array<i64: 1, 128>}, {pipeline_mode = #tpu.pipeline_mode<synchronous>, transform_indices = @transform_7, window_bounds = array<i64: 128, 128>}, {pipeline_mode = #tpu.pipeline_mode<synchronous>, transform_indices = @transform_8, window_bounds = array<i64: 1, 128>}, {transform_indices = @transform_9, window_bounds = array<i64: 16, 128>}]} {
    %c0_i32 = arith.constant 0 : i32
    %0 = arith.cmpi eq, %arg1, %c0_i32 : i32
    %1 = arith.extui %0 : i1 to i32
    %c0_i32_0 = arith.constant 0 : i32
    %2 = arith.cmpi ne, %1, %c0_i32_0 : i32
    scf.if %2 {
      %cst_9 = arith.constant 0.000000e+00 : f32
      %12 = vector.broadcast %cst_9 : f32 to vector<16x128xf32>
      %c0_10 = arith.constant 0 : index
      %c0_11 = arith.constant 0 : index
      %13 = vector.load %arg12[%c0_10, %c0_11] : memref<16x128xf32, #tpu.memory_space<vmem>>, vector<16x128xf32>
      tpu.vector_store %arg12[%c0_10, %c0_11], %12 {strides = array<i32>} : memref<16x128xf32, #tpu.memory_space<vmem>>, vector<16x128xf32>,
    } else {
    }
    %c0 = arith.constant 0 : index
    %c0_1 = arith.constant 0 : index
    %3 = vector.load %arg12[%c0, %c0_1] : memref<16x128xf32, #tpu.memory_space<vmem>>, vector<16x128xf32>
    %c0_2 = arith.constant 0 : index
    %c0_3 = arith.constant 0 : index
    %4 = vector.load %arg2[%c0_2, %c0_3] : memref<16x256xbf16, #tpu.memory_space<vmem>>, vector<16x256xbf16>
    %c0_4 = arith.constant 0 : index
    %c0_5 = arith.constant 0 : index
    %5 = vector.load %arg3[%c0_4, %c0_5] : memref<256x128xbf16, #tpu.memory_space<vmem>>, vector<256x128xbf16>
    %cst = arith.constant dense<0.000000e+00> : vector<16x128xf32>
    %6 = tpu.matmul %4, %5, %cst {dimension_numbers = #tpu.dot_dimension_numbers<[1], [0], [0], [1], [0, 0, 1, 1], [], []>} : vector<16x256xbf16>, vector<256x128xbf16>, vector<16x128xf32> -> vector<16x128xf32>
    %7 = arith.addf %3, %6 : vector<16x128xf32>
    %c0_6 = arith.constant 0 : index
    %c0_7 = arith.constant 0 : index
    %8 = vector.load %arg12[%c0_6, %c0_7] : memref<16x128xf32, #tpu.memory_space<vmem>>, vector<16x128xf32>
    tpu.vector_store %arg12[%c0_6, %c0_7], %7 {strides = array<i32>} : memref<16x128xf32, #tpu.memory_space<vmem>>, vector<16x128xf32>,
    %c2_i32 = arith.constant 2 : i32
    %9 = arith.cmpi eq, %arg1, %c2_i32 : i32
    %10 = arith.extui %9 : i1 to i32
    %c0_i32_8 = arith.constant 0 : i32
    %11 = arith.cmpi ne, %10, %c0_i32_8 : i32
    scf.if %11 {
      %c0_9 = arith.constant 0 : index
      %c0_10 = arith.constant 0 : index
      %12 = vector.load %arg12[%c0_9, %c0_10] : memref<16x128xf32, #tpu.memory_space<vmem>>, vector<16x128xf32>
      %c0_11 = arith.constant 0 : index
      %c0_12 = arith.constant 0 : index
      %13 = vector.load %arg4[%c0_11, %c0_12] : memref<1x128xf32, #tpu.memory_space<vmem>>, vector<1x128xf32>
      %14 = vector.broadcast %13 : vector<1x128xf32> to vector<16x128xf32>
      %15 = arith.addf %12, %14 : vector<16x128xf32>
      %16 = arith.truncf %15 : vector<16x128xf32> to vector<16x128xbf16>
      %c0_13 = arith.constant 0 : index
      %c0_14 = arith.constant 0 : index
      %17 = vector.load %arg5[%c0_13, %c0_14] : memref<128x256xbf16, #tpu.memory_space<vmem>>, vector<128x256xbf16>
      %cst_15 = arith.constant dense<0.000000e+00> : vector<16x256xf32>
      %18 = tpu.matmul %16, %17, %cst_15 {dimension_numbers = #tpu.dot_dimension_numbers<[1], [0], [0], [1], [0, 0, 1, 1], [], []>} : vector<16x128xbf16>, vector<128x256xbf16>, vector<16x256xf32> -> vector<16x256xf32>
      %c0_16 = arith.constant 0 : index
      %c0_17 = arith.constant 0 : index
      %19 = vector.load %arg6[%c0_16, %c0_17] : memref<1x256xf32, #tpu.memory_space<vmem>>, vector<1x256xf32>
      %20 = vector.broadcast %19 : vector<1x256xf32> to vector<16x256xf32>
      %21 = arith.addf %18, %20 : vector<16x256xf32>
      %22 = arith.truncf %21 : vector<16x256xf32> to vector<16x256xbf16>
      %c0_18 = arith.constant 0 : index
      %c0_19 = arith.constant 0 : index
      %23 = vector.load %arg7[%c0_18, %c0_19] : memref<256x128xbf16, #tpu.memory_space<vmem>>, vector<256x128xbf16>
      %cst_20 = arith.constant dense<0.000000e+00> : vector<16x128xf32>
      %24 = tpu.matmul %22, %23, %cst_20 {dimension_numbers = #tpu.dot_dimension_numbers<[1], [0], [0], [1], [0, 0, 1, 1], [], []>} : vector<16x256xbf16>, vector<256x128xbf16>, vector<16x128xf32> -> vector<16x128xf32>
      %c0_21 = arith.constant 0 : index
      %c0_22 = arith.constant 0 : index
      %25 = vector.load %arg8[%c0_21, %c0_22] : memref<1x128xf32, #tpu.memory_space<vmem>>, vector<1x128xf32>
      %26 = vector.broadcast %25 : vector<1x128xf32> to vector<16x128xf32>
      %27 = arith.addf %24, %26 : vector<16x128xf32>
      %cst_23 = arith.constant 0.000000e+00 : f32
      %28 = vector.broadcast %cst_23 : f32 to vector<16x128xf32>
      %29 = arith.maximumf %27, %28 : vector<16x128xf32>
      %30 = arith.truncf %29 : vector<16x128xf32> to vector<16x128xbf16>
      %c0_24 = arith.constant 0 : index
      %c0_25 = arith.constant 0 : index
      %31 = vector.load %arg9[%c0_24, %c0_25] : memref<128x128xbf16, #tpu.memory_space<vmem>>, vector<128x128xbf16>
      %cst_26 = arith.constant dense<0.000000e+00> : vector<16x128xf32>
      %32 = tpu.matmul %30, %31, %cst_26 {dimension_numbers = #tpu.dot_dimension_numbers<[1], [0], [0], [1], [0, 0, 1, 1], [], []>} : vector<16x128xbf16>, vector<128x128xbf16>, vector<16x128xf32> -> vector<16x128xf32>
      %c0_27 = arith.constant 0 : index
      %c0_28 = arith.constant 0 : index
      %33 = vector.load %arg10[%c0_27, %c0_28] : memref<1x128xf32, #tpu.memory_space<vmem>>, vector<1x128xf32>
      %34 = vector.broadcast %33 : vector<1x128xf32> to vector<16x128xf32>
      %35 = arith.addf %32, %34 : vector<16x128xf32>
      %c0_29 = arith.constant 0 : index
      %c0_30 = arith.constant 0 : index
      %36 = vector.load %arg11[%c0_29, %c0_30] : memref<16x128xf32, #tpu.memory_space<vmem>>, vector<16x128xf32>
      tpu.vector_store %arg11[%c0_29, %c0_30], %35 {strides = array<i32>} : memref<16x128xf32, #tpu.memory_space<vmem>>, vector<16x128xf32>,
    } else {
    }
    return
  }
  func.func @transform_0(%arg0: i32, %arg1: i32) -> (i32, i32) {
    %c0_i32 = arith.constant 0 : i32
    return %arg0, %arg1 : i32, i32
  }
  func.func @transform_1(%arg0: i32, %arg1: i32) -> (i32, i32) {
    %c0_i32 = arith.constant 0 : i32
    %c0_i32_0 = arith.constant 0 : i32
    return %arg1, %c0_i32 : i32, i32
  }
  func.func @transform_2(%arg0: i32, %arg1: i32) -> (i32, i32) {
    %c0_i32 = arith.constant 0 : i32
    %c0_i32_0 = arith.constant 0 : i32
    %c0_i32_1 = arith.constant 0 : i32
    return %c0_i32, %c0_i32_0 : i32, i32
  }
  func.func @transform_3(%arg0: i32, %arg1: i32) -> (i32, i32) {
    %c0_i32 = arith.constant 0 : i32
    %c0_i32_0 = arith.constant 0 : i32
    %c0_i32_1 = arith.constant 0 : i32
    return %c0_i32, %c0_i32_0 : i32, i32
  }
  func.func @transform_4(%arg0: i32, %arg1: i32) -> (i32, i32) {
    %c0_i32 = arith.constant 0 : i32
    %c0_i32_0 = arith.constant 0 : i32
    %c0_i32_1 = arith.constant 0 : i32
    return %c0_i32, %c0_i32_0 : i32, i32
  }
  func.func @transform_5(%arg0: i32, %arg1: i32) -> (i32, i32) {
    %c0_i32 = arith.constant 0 : i32
    %c0_i32_0 = arith.constant 0 : i32
    %c0_i32_1 = arith.constant 0 : i32
    return %c0_i32, %c0_i32_0 : i32, i32
  }
  func.func @transform_6(%arg0: i32, %arg1: i32) -> (i32, i32) {
    %c0_i32 = arith.constant 0 : i32
    %c0_i32_0 = arith.constant 0 : i32
    %c0_i32_1 = arith.constant 0 : i32
    return %c0_i32, %c0_i32_0 : i32, i32
  }
  func.func @transform_7(%arg0: i32, %arg1: i32) -> (i32, i32) {
    %c0_i32 = arith.constant 0 : i32
    %c0_i32_0 = arith.constant 0 : i32
    %c0_i32_1 = arith.constant 0 : i32
    return %c0_i32, %c0_i32_0 : i32, i32
  }
  func.func @transform_8(%arg0: i32, %arg1: i32) -> (i32, i32) {
    %c0_i32 = arith.constant 0 : i32
    %c0_i32_0 = arith.constant 0 : i32
    %c0_i32_1 = arith.constant 0 : i32
    return %c0_i32, %c0_i32_0 : i32, i32
  }
  func.func @transform_9(%arg0: i32, %arg1: i32) -> (i32, i32) {
    %c0_i32 = arith.constant 0 : i32
    %c0_i32_0 = arith.constant 0 : i32
    return %arg0, %c0_i32 : i32, i32
  }
}

</mosaic_0001>

<bundles_post_ra>
// kernel: tpu_custom_call.1
= control target key start
LH: loop header
LB: loop body
LE: loop exit
PB: predicated region body
PF: predicated region fallthrough
CT: control target
= control target key end

     0   :  { %s2207_s0 = inlined_call_operand.hbm [shape: bf16[16,768], index: 0, kind: input, shape index: {}]   ;;  %s2208_s1 = inlined_call_operand.hbm [shape: bf16[768,128], index: 1, kind: input, shape index: {}]   ;;  %s2209_s2 = inlined_call_operand.vmem [shape: f32[1,128], index: 2, kind: input, shape index: {}]   ;;  %s2210_s3 = inlined_call_operand.hbm [shape: bf16[128,256], index: 3, kind: input, shape index: {}]   ;;  %s2211_s4 = inlined_call_operand.vmem [shape: f32[1,256], index: 4, kind: input, shape index: {}]   ;;  %s2212_s5 = inlined_call_operand.hbm [shape: bf16[256,128], index: 5, kind: input, shape index: {}]   ;;  %s2213_s6 = inlined_call_operand.vmem [shape: f32[1,128], index: 6, kind: input, shape index: {}]   ;;  %s2214_s7 = inlined_call_operand.hbm [shape: bf16[128,128], index: 7, kind: input, shape index: {}]   ;;  %s2215_s8 = inlined_call_operand.vmem [shape: f32[1,128], index: 8, kind: input, shape index: {}]   ;;  %s2216_s9 = inlined_call_operand.hbm [shape: f32[16,128], index: 9, kind: output, shape index: {}]  }
   0x1   :  { %2226 = sst [smem:[#allocation18_spill]] %s2207_s0 }
   0x2   :  { %2227 = sst [smem:[#allocation19_spill]] %s2210_s3 }
   0x3   :  { %2228 = sst [smem:[#allocation20_spill]] %s2212_s5 }
   0x4   :  { %2229 = sst [smem:[#allocation21_spill]] %s2213_s6 }
   0x5   :  { %2230 = sst [smem:[#allocation22_spill]] %s2214_s7 }
   0x6   :  { %2231 = sst [smem:[#allocation23_spill]] %s2215_s8 }
   0x7   :  { %2232 = sst [smem:[#allocation24_spill]] %s2216_s9 }
   0x8   :  { %14 = vsyncpa [#allocation4], 0 }
   0x9   :  { %16 = vsyncpa [#allocation4 + $0x1], 0 }
   0xa   :  { %17 = vsyncpa [#allocation7], 0 }
   0xb   :  { %19 = vsyncpa [#allocation7 + $0x1], 0 }
   0xc   :  { %20 = vsyncpa [#allocation10], 0 }
   0xd   :  { %21 = vsyncpa [#allocation5], 0  ;;  %s1872_s30 = smov 0   ;;  %s1874_s10 = smov 0  }
   0xe   :  { %s1876_s11 = smov 0   ;;  %s1878_s12 = smov 0  }
   0xf   :  { %s1880_s13 = smov 0   ;;  %s1882_s14 = smov 0  }
  0x10 LB: > { %s1901_s15 = sadd.s32 4294967295, %s1803_s14   ;;  %p55_p0 = scmp.ne.s32.totalorder %s1791_s11, %s1787_s10  ;;  %s1803_s14 = sphi %s1882_s14, %s27_s14   ;;  %s1799_s13 = sphi %s1880_s13, %s2263_s13   ;;  %s1795_s12 = sphi %s1878_s12, %s2262_s12   ;;  %s1791_s11 = sphi %s1876_s11, %s2261_s11   ;;  %s1787_s10 = sphi %s1874_s10, %s2260_s10   ;;  %s1783_s30 = sphi %s1872_s30, %s2259_s30  }
  0x11   : > { %p56_p1 = scmp.eq.s32.totalorder %s1803_s14, 0  ;;  %p61_p2 = scmp.ne.s32.totalorder %s1787_s10, %s1783_s30 }
  0x12   : > { %p2217_p3 = scmp.eq.s32.totalorder %s1901_s15, 0  ;;  %p1232_p5 = scmp.ge.s32.totalorder %s1803_s14, 1 }
  0x13   : > { %p57_p4 = por %p56_p1, %p55_p0  ;;  %p271_p7 = scmp.lt.s32.totalorder %s1803_s14, 4 }
  0x14   : > { %p1912_p6 = por %p2217_p3, %p61_p2  ;;  %s1805_s19 = smov [#allocation8]  }
  0x15   : > { %p1917_p8 = pnand %p1232_p5, %p271_p7  ;;  %s286_s20 = sshll.u32 %s1805_s19, 4  ;;  %s1921_s20 = int_to_ptr.vmem [resolvable:$true] %s286_s20 }
  0x16   : > { %s2233_s17 = scalar_select %p1912_p6, 1, 0 }
  0x17   : > { %s2234_s18 = scalar_select %p1917_p8, 1, 0 }
  0x18   : > { %p1411_p9 = pneg %p1917_p8  ;;  %p1431_p10 = scmp.lt.s32.totalorder %s1803_s14, 3 }
  0x19   : > { %s1806_s23 = smov [#allocation9]   ;;  %s2237_s3 = sld [smem:[#allocation19_spill]] }
  0x1a   : > { %p1928_p11 = pnand %p1411_p9, %p2217_p3  ;;  %p1932_p12 = pnand %p1431_p10, %p57_p4 }
  0x1b   : > { %s302_s24 = sshll.u32 %s1806_s23, 4  ;;  %s1936_s24 = int_to_ptr.vmem [resolvable:$true] %s302_s24 }
  0x1c   : > { %s2236_s22 = scalar_select %p1932_p12, 1, 0 }
  0x1d   : > { %p1946_p0 = pneg %p1928_p11 }
  0x1f   : > { %s1567_s27 = scalar_lea.hbm %s2237_s3, 2048 }
  0x20   : > { %p1568_p13 = scmp.ne.s32.totalorder %s2237_s3, %s1567_s27  ;;  %p1574_p4 = scmp.lt.u32.totalorder %s1567_s27, %s2237_s3 }
  0x22   : > { %p1570_p1 = pnand %p1946_p0, %p1568_p13 }
  0x24   : > { %p1571_p2 = pneg %p1570_p1 }
  0x26   : > { %p1576_p5 = pnand %p1574_p4, %p1571_p2 }
  0x28   : > { %1579 = shalt.err (!%p1576_p5)
}
  0x29   : > { %s1580_s25 = scalar_lea.vmem %s1921_s20, 2048  ;;  %p1588_p3 = scmp.lt.s32.totalorder %s1921_s20, %s1921_s20 }
  0x2a   : > { %p1581_p7 = scmp.ne.s32.totalorder %s1921_s20, %s1580_s25  ;;  %p1589_p6 = scmp.lt.s32.totalorder %s1580_s25, %s1580_s25 }
  0x2c   : > { %p1583_p9 = pnand %p1581_p7, %p1946_p0  ;;  %p1590_p13 = por %p1589_p6, %p1588_p3 }
  0x2e   : > { %p1584_p10 = pneg %p1583_p9 }
  0x30   : > { %p1591_p1 = pnand %p1590_p13, %p1584_p10 }
  0x32   : > { %1594 = shalt.err (!%p1591_p1)
}
  0x33   : > { %s2220_s26 = smov 128   ;;  %s2221_s27 = smov 8  }
  0x34   : > { %1414 = dma.hbm_to_vmem [thread:$0]  (!%p1928_p11), %s2237_s3, 2048, %s1921_s20, [#allocation7], %s2220_s26, %s2220_s26, %s2221_s27  }
  0x35   : > { %s2239_s5 = sld [smem:[#allocation20_spill]] }
  0x3b   : > { %s1595_s25 = scalar_lea.hbm %s2239_s5, 2048 }
  0x3c   : > { %p1596_p3 = scmp.ne.s32.totalorder %s2239_s5, %s1595_s25  ;;  %p1602_p4 = scmp.lt.u32.totalorder %s1595_s25, %s2239_s5 }
  0x3e   : > { %p1598_p6 = pnand %p1596_p3, %p1946_p0 }
  0x40   : > { %p1599_p2 = pneg %p1598_p6 }
  0x42   : > { %p1604_p5 = pnand %p1602_p4, %p1599_p2 }
  0x44   : > { %1607 = shalt.err (!%p1604_p5)
}
  0x45   : > { %s1608_s20 = scalar_lea.vmem %s1936_s24, 2048  ;;  %p1616_p13 = scmp.lt.s32.totalorder %s1936_s24, %s1936_s24 }
  0x46   : > { %p1609_p7 = scmp.ne.s32.totalorder %s1936_s24, %s1608_s20  ;;  %p1617_p1 = scmp.lt.s32.totalorder %s1608_s20, %s1608_s20 }
  0x48   : > { %p1611_p9 = pnand %p1609_p7, %p1946_p0  ;;  %p1618_p3 = por %p1617_p1, %p1616_p13 }
  0x4a   : > { %p1612_p10 = pneg %p1611_p9 }
  0x4c   : > { %p1619_p6 = pnand %p1618_p3, %p1612_p10 }
  0x4e   : > { %1622 = shalt.err (!%p1619_p6)
}
  0x4f   : > { %s2224_s9 = smov 64   ;;  %s2225_s6 = smov 4  }
  0x50   : > { %1417 = dma.hbm_to_vmem [thread:$0]  (!%p1928_p11), %s2239_s5, 2048, %s1936_s24, [#allocation10], %s2224_s9, %s2224_s9, %s2225_s6  }
  0x51   : > { %s1811_s28 = smov [#allocation11]   ;;  %s2240_s7 = sld [smem:[#allocation22_spill]] }
  0x52   : > { %s318_s29 = sshll.u32 %s1811_s28, 4  ;;  %s319_s29 = int_to_ptr.vmem [resolvable:$true] %s318_s29 }
  0x57   : > { %s1623_s25 = scalar_lea.hbm %s2240_s7, 1024 }
  0x58   : > { %p1624_p2 = scmp.ne.s32.totalorder %s2240_s7, %s1623_s25  ;;  %p1630_p7 = scmp.lt.u32.totalorder %s1623_s25, %s2240_s7 }
  0x5a   : > { %p1626_p4 = pnand %p1624_p2, %p1946_p0 }
  0x5c   : > { %p1627_p5 = pneg %p1626_p4 }
  0x5e   : > { %p1632_p9 = pnand %p1630_p7, %p1627_p5 }
  0x60   : > { %1635 = shalt.err (!%p1632_p9)
}
  0x61   : > { %s1636_s24 = scalar_lea.vmem %s319_s29, 1024  ;;  %p1644_p3 = scmp.lt.s32.totalorder %s319_s29, %s319_s29 }
  0x62   : > { %p1637_p10 = scmp.ne.s32.totalorder %s319_s29, %s1636_s24  ;;  %p1645_p6 = scmp.lt.s32.totalorder %s1636_s24, %s1636_s24 }
  0x64   : > { %p1639_p13 = pnand %p1637_p10, %p1946_p0  ;;  %p1646_p8 = por %p1645_p6, %p1644_p3 }
  0x66   : > { %p1640_p1 = pneg %p1639_p13 }
  0x68   : > { %p1647_p12 = pnand %p1646_p8, %p1640_p1 }
  0x6a   : > { %1650 = shalt.err (!%p1647_p12)
}
  0x6b   : > { %1420 = dma.hbm_to_vmem [thread:$0]  (!%p1928_p11), %s2240_s7, 1024, %s319_s29, [#allocation10], %s2224_s9, %s2224_s9, %s2225_s6  }
  0x6c   : > { %s36_s30 = sadd.s32 1, %s1799_s13  ;;  %s2019_s27 = sand.u32 1, %s1791_s11  }
  0x6d   : > { %p37_p8 = scmp.ge.s32.totalorder %s36_s30, 3  ;;  %s1237_s21 = sshll.u32 %s2019_s27, 4 }
  0x6e   : > { %s1316_s8 = sshll.u32 %s1799_s13, 7  ;;  %s2241_s0 = sld [smem:[#allocation18_spill]] }
  0x6f   : > { %s2265_s30 = smov (%p37_p8, %s36_s30), 0  ;;  %s339_s23 = scalar_lea.vmem [#allocation3], %s1237_s21 }
  0x70   : > { %s44_s29 = ssub.s32 %s1799_s13, %s2265_s30  ;;  %s349_s25 = sshll.u32 %s339_s23, 4  ;;  %s2032_s25 = int_to_ptr.vmem [resolvable:$true] %s349_s25 }
  0x71   : > { %p46_p11 = scmp.eq.s32.totalorder %s44_s29, 0  ;;  %s2242_s24 = sadd.s32 1, %s1791_s11 }
  0x72   : > { %s336_s26 = scalar_lea.sflag [#allocation4], %s2019_s27  ;;  %p2243_p0 = scmp.ne.s32.totalorder %s2236_s22, 0 }
  0x73   : > { %s2038_s3 = scalar_select %p46_p11, %s1791_s11, %s2242_s24  }
  0x74   : > { %s2028_s19 = scalar_lea.hbm %s2241_s0, %s1316_s8  ;;  %p1653_p2 = pneg %p2243_p0 }
  0x75   : > { %s1651_s9 = scalar_lea.hbm %s2028_s19, 256  ;;  %s1656_s16 = scalar_lea.hbm %s2241_s0, 768 }
  0x76   : > { %p1652_p12 = scmp.ne.s32.totalorder %s2028_s19, %s1651_s9  ;;  %p1657_p7 = scmp.lt.u32.totalorder %s2028_s19, %s2241_s0 }
  0x77   : > { %p1658_p9 = scmp.lt.u32.totalorder %s1656_s16, %s1651_s9  ;;  %p1660_p13 = scmp.lt.u32.totalorder %s1651_s9, %s2028_s19 }
  0x78   : > { %p1654_p4 = pnand %p1653_p2, %p1652_p12 }
  0x79   : > { %p1659_p10 = por %p1658_p9, %p1657_p7 }
  0x7a   : > { %p1655_p5 = pneg %p1654_p4 }
  0x7b   : > { %p1661_p1 = por %p1660_p13, %p1659_p10 }
  0x7d   : > { %p1662_p3 = pnand %p1661_p1, %p1655_p5 }
  0x7f   : > { %1665 = shalt.err (!%p1662_p3)
}
  0x80   : > { %s1666_s23 = scalar_lea.vmem %s2032_s25, 256  ;;  %s1812_s24 = smov [#allocation3]  }
  0x81   : > { %p1667_p6 = scmp.ne.s32.totalorder %s2032_s25, %s1666_s23  ;;  %s1671_s8 = sshll.u32 %s1812_s24, 4  ;;  %s1672_s8 = int_to_ptr.vmem [resolvable:$false] %s1671_s8 }
  0x82   : > { %s1673_s21 = scalar_lea.vmem %s1672_s8, 512  ;;  %p1674_p12 = scmp.lt.s32.totalorder %s2032_s25, %s1672_s8 }
  0x83   : > { %p1669_p8 = pnand %p1667_p6, %p1653_p2  ;;  %p1675_p4 = scmp.lt.s32.totalorder %s1673_s21, %s1666_s23 }
  0x85   : > { %p1670_p11 = pneg %p1669_p8  ;;  %p1676_p7 = por %p1675_p4, %p1674_p12 }
  0x87   : > { %p1677_p9 = pnand %p1676_p7, %p1670_p11 }
  0x89   : > { %1680 = shalt.err (!%p1677_p9)
}
  0x8a   : > { %s1813_s9 = smov 384   ;;  %s2244_s16 = smov 8  }
  0x8b   : > { %s2245_s28 = smov 128   ;;  %s1240_s29 = sshll.u32 %s2019_s27, 7 }
  0x8c   : > { %1424 = dma.hbm_to_vmem [thread:$0]  (!%p2243_p0), %s2028_s19, 256, %s2032_s25, %s336_s26, %s1813_s9, %s2245_s28, %s2244_s16  }
  0x8d   : > { %s1317_s24 = sshll.u32 %s1799_s13, 11  ;;  %s363_s6 = scalar_lea.vmem [#allocation6], %s1240_s29 }
  0x8e   : > { %s2075_s21 = scalar_lea.hbm %s2208_s1, %s1317_s24  ;;  %s370_s20 = sshll.u32 %s363_s6, 4  ;;  %s2077_s20 = int_to_ptr.vmem [resolvable:$true] %s370_s20 }
  0x8f   : > { %s2246_s0 = sand.u32 1, %s1803_s14   ;;  %s1681_s7 = scalar_lea.hbm %s2075_s21, 2048 }
  0x90   : > { %s2081_s5 = scalar_lea.sflag [#allocation7], %s2246_s0  ;;  %p1682_p5 = scmp.ne.s32.totalorder %s2075_s21, %s1681_s7 }
  0x91   : > { %s1686_s25 = scalar_lea.hbm %s2208_s1, 6144  ;;  %p1687_p1 = scmp.lt.u32.totalorder %s2075_s21, %s2208_s1 }
  0x92   : > { %p1684_p10 = pnand %p1682_p5, %p1653_p2  ;;  %p1688_p3 = scmp.lt.u32.totalorder %s1686_s25, %s1681_s7 }
  0x93   : > { %p1690_p8 = scmp.lt.u32.totalorder %s1681_s7, %s2075_s21 }
  0x94   : > { %p1685_p13 = pneg %p1684_p10  ;;  %p1689_p6 = por %p1688_p3, %p1687_p1 }
  0x96   : > { %p1691_p11 = por %p1690_p8, %p1689_p6 }
  0x98   : > { %p1692_p12 = pnand %p1691_p11, %p1685_p13 }
  0x9a   : > { %1695 = shalt.err (!%p1692_p12)
}
  0x9b   : > { %s1696_s0 = scalar_lea.vmem %s2077_s20, 2048  ;;  %s1814_s6 = smov [#allocation6]  }
  0x9c   : > { %p1697_p4 = scmp.ne.s32.totalorder %s2077_s20, %s1696_s0  ;;  %s1701_s16 = sshll.u32 %s1814_s6, 4  ;;  %s1702_s16 = int_to_ptr.vmem [resolvable:$false] %s1701_s16 }
  0x9d   : > { %s1703_s28 = scalar_lea.vmem %s1702_s16, 4096  ;;  %p1704_p5 = scmp.lt.s32.totalorder %s2077_s20, %s1702_s16 }
  0x9e   : > { %p1699_p7 = pnand %p1697_p4, %p1653_p2  ;;  %p1705_p10 = scmp.lt.s32.totalorder %s1703_s28, %s1696_s0 }
  0xa0   : > { %p1700_p9 = pneg %p1699_p7  ;;  %p1706_p1 = por %p1705_p10, %p1704_p5 }
  0xa2   : > { %p1707_p3 = pnand %p1706_p1, %p1700_p9 }
  0xa4   : > { %1710 = shalt.err (!%p1707_p3)
}
  0xa5   : > { %s2247_s7 = smov 4   ;;  %s2248_s29 = smov 64  }
  0xa6   : > { %1427 = dma.hbm_to_vmem [thread:$0]  (!%p2243_p0), %s2075_s21, 2048, %s2077_s20, %s2081_s5, %s2248_s29, %s2248_s29, %s2247_s7  }
  0xa7   : > { %p2249_p2 = scmp.ne.s32.totalorder %s2234_s18, 0 }
  0xa8   : > { %s384_s24 = sand.u32 (!%p2249_p2), 1, %s1787_s10   ;;  %p2250_p13 = scmp.ne.s32.totalorder (!%p2249_p2), %s2233_s17, 0 }
  0xa9   : > { %382 = sbr.rel (%p2249_p2) target bundleno = 1151 (0x47f), region = 56  ;;  %s1244_s23 = sshll.u32 (!%p2249_p2), %s384_s24, 4 }
  0xaa   : > { %s385_s8 = scalar_lea.sflag (!%p2249_p2), [#allocation4], %s384_s24  ;;  %s2113_s27 = scalar_lea.vmem (!%p2249_p2), [#allocation3], %s1244_s23 }
  0xb0   : > { %1762 = dma.done.wait (%p2250_p13), %s385_s8, 256  }
  0xb1   : > { %1764 = vsyncadd (%p2250_p13), %s385_s8, 4294967040  ;;  %s393_s22 = sand.u32 1, %s1901_s15   ;;  %s1245_s19 = sshll.u32 %s384_s24, 7 }
  0xb2   : > { %s394_s5 = scalar_lea.sflag [#allocation7], %s393_s22  ;;  %s2120_s20 = scalar_lea.vmem [#allocation6], %s1245_s19 }
  0xb3   : > { %1766 = dma.done.wait (%p2250_p13), %s394_s5, 2048  }
  0xb4   : > { %1768 = vsyncadd (%p2250_p13), %s394_s5, 4294965248  ;;  %p2251_p0 = scmp.eq.s32.totalorder %s1901_s15, 0 }
  0xb6   : > { %1770 = dma.done.wait (%p2251_p0), [#allocation7], 2048   ;;  %p2252_p6 = pmov %p2251_p0 }
  0xb7   : > { %p2253_p8 = pmov %p2251_p0 }
  0xb8   : > { %1772 = vsyncadd (%p2252_p6), [#allocation7], 4294965248 }
  0xb9   : > { %1774 = dma.done.wait (%p2253_p8), [#allocation10], 3072   ;;  %p2254_p11 = pmov %p2251_p0 }
  0xba   : > { %p1249_p12 = scmp.ne.s32.totalorder %s1795_s12, 0 }
  0xbb   : > { %1776 = vsyncadd (%p2254_p11), [#allocation10], 4294964224  ;;  %v1815_v0 = vmov (!%p1249_p12), 0.0  }
  0xbc   : > { %452 = sbr.rel (%p1249_p12) target bundleno = 195 (0xc3), region = 80  ;;  %453 = vst [vmem:[#allocation2] sm:$0xff] (!%p1249_p12), %v1815_v0  ;;  %454 = vst [vmem:[#allocation2 + $0x8] sm:$0xff] (!%p1249_p12), %v1815_v0 }
  0xc3 PF: > { %v1500_v1 = vld [vmem:[%s2120_s20 + $0x40] sm:$0xff]   ;;  %v1502_v3 = vld [vmem:[%s2120_s20 + $0x48] sm:$0xff]   ;;  %v1504_v5 = vld [vmem:[%s2120_s20 + $0x50] sm:$0xff]   ;;  %p1268_p4 = scmp.ne.s32.totalorder %s1795_s12, 2 }
  0xc4   : > { %v1501_v2 = vld [vmem:[%s2120_s20] sm:$0xff]   ;;  %1318 = vmatprep.subr.bf16.mxu0 %v1500_v1  ;;  %v1503_v4 = vld [vmem:[%s2120_s20 + $0x8] sm:$0xff]   ;;  %v1505_v6 = vld [vmem:[%s2120_s20 + $0x10] sm:$0xff]   ;;  %v1816_v31 = vmov (!%p1268_p4), 0   ;;  %vm1818_vm0 = vmmov (!%p1268_p4), 0   ;;  %s2255_s9 = sld [smem:[#allocation21_spill]] (!%p1268_p4) }
  0xc5   : > { %1319 = vmatpush3.bf16.msra.mxu0 %v1501_v2  ;;  %v1506_v7 = vld [vmem:[%s2120_s20 + $0x58] sm:$0xff]   ;;  %v1508_v9 = vld [vmem:[%s2120_s20 + $0x60] sm:$0xff]   ;;  %v1510_v11 = vld [vmem:[%s2120_s20 + $0x68] sm:$0xff]   ;;  %s2256_s16 = sld [smem:[#allocation23_spill]] (!%p1268_p4) }
  0xc6   : > { %1320 = vmatprep.subr.bf16.mxu0 %v1502_v3  ;;  %v1507_v8 = vld [vmem:[%s2120_s20 + $0x18] sm:$0xff]   ;;  %v1509_v10 = vld [vmem:[%s2120_s20 + $0x20] sm:$0xff]   ;;  %v1511_v13 = vld [vmem:[%s2120_s20 + $0x28] sm:$0xff]  }
  0xc7   : > { %v1518_v12 = vld [vmem:[%s2113_s27 + $0x4] ss:$8 sps:$4 sm:$0xff]   ;;  %v1516_v18 = vld [vmem:[%s2113_s27] ss:$8 sps:$4 sm:$0xff]  }
  0xc8   : > { %629 = vmatprep.mubr.bf16.mxu0 %v1518_v12  ;;  %v1512_v14 = vld [vmem:[%s2120_s20 + $0x70] sm:$0xff]   ;;  %v1514_v16 = vld [vmem:[%s2120_s20 + $0x78] sm:$0xff]   ;;  %v1519_v29 = vld [vmem:[#allocation8 + $0x4] ss:$8 sps:$4 sm:$0xff] (!%p1268_p4)  }
  0xc9   : > { %1321 = vmatpush3.bf16.msra.mxu0 %v1503_v4  ;;  %v1513_v15 = vld [vmem:[%s2120_s20 + $0x30] sm:$0xff]   ;;  %v1515_v17 = vld [vmem:[%s2120_s20 + $0x38] sm:$0xff]   ;;  %v1521_v30 = vld [vmem:[#allocation8] ss:$8 sps:$4 sm:$0xff] (!%p1268_p4)  }
  0xca   : > { %1322 = vmatprep.subr.bf16.mxu0 %v1504_v5  ;;  %v455_v20 = vld [vmem:[#allocation2] sm:$0xff]  ;;  %v456_v24 = vld [vmem:[#allocation2 + $0x8] sm:$0xff]  ;;  %v1525_v34 = vld [vmem:[#allocation8 + $0x24] ss:$8 sps:$4 sm:$0xff] (!%p1268_p4)   ;;  %v1817_v5 = vmov (!%p1268_p4), 0.0  }
  0xcb   : > { %v1522_v32 = vld [vmem:[#allocation8 + $0x14] ss:$8 sps:$4 sm:$0xff] (!%p1268_p4)   ;;  %v1524_v33 = vld [vmem:[#allocation8 + $0x10] ss:$8 sps:$4 sm:$0xff] (!%p1268_p4)   ;;  %v1527_v35 = vld [vmem:[#allocation8 + $0x20] ss:$8 sps:$4 sm:$0xff] (!%p1268_p4)  }
  0xcc   : > { %v1528_v36 = vld [vmem:[#allocation8 + $0x34] ss:$8 sps:$4 sm:$0xff] (!%p1268_p4)   ;;  %v1530_v37 = vld [vmem:[#allocation8 + $0x30] ss:$8 sps:$4 sm:$0xff] (!%p1268_p4)   ;;  %v1531_v38 = vld [vmem:[#allocation8 + $0x44] ss:$8 sps:$4 sm:$0xff] (!%p1268_p4)  }
  0xcd   : > { %1323 = vmatpush3.bf16.msra.mxu0 %v1505_v6  ;;  %v1543_v39 = vld [vmem:[#allocation9 + $0x40] sm:$0xff] (!%p1268_p4)   ;;  %v1534_v42 = vld [vmem:[#allocation8 + $0x54] ss:$8 sps:$4 sm:$0xff] (!%p1268_p4)   ;;  %v1545_v43 = vld [vmem:[#allocation9 + $0x48] sm:$0xff] (!%p1268_p4)  }
  0xce   : > { %1324 = vmatprep.subr.bf16.mxu0 %v1506_v7  ;;  %v1533_v40 = vld [vmem:[#allocation8 + $0x40] ss:$8 sps:$4 sm:$0xff] (!%p1268_p4)   ;;  %1340 = vmatprep.subr.bf16.mxu1 (!%p1268_p4), %v1543_v39  ;;  %v1547_v45 = vld [vmem:[#allocation9 + $0x50] sm:$0xff] (!%p1268_p4)   ;;  %v1537_v47 = vld [vmem:[#allocation8 + $0x64] ss:$8 sps:$4 sm:$0xff] (!%p1268_p4)  }
  0xcf   : > { %v1544_v41 = vld [vmem:[#allocation9] sm:$0xff] (!%p1268_p4)   ;;  %v1546_v44 = vld [vmem:[#allocation9 + $0x8] sm:$0xff] (!%p1268_p4)   ;;  %v1536_v46 = vld [vmem:[#allocation8 + $0x50] ss:$8 sps:$4 sm:$0xff] (!%p1268_p4)  }
  0xd0   : > { %1341 = vmatpush3.bf16.msra.mxu1 (!%p1268_p4), %v1544_v41  ;;  %v1548_v48 = vld [vmem:[#allocation9 + $0x10] sm:$0xff] (!%p1268_p4)   ;;  %v1549_v49 = vld [vmem:[#allocation9 + $0x58] sm:$0xff] (!%p1268_p4)   ;;  %v1539_v50 = vld [vmem:[#allocation8 + $0x60] ss:$8 sps:$4 sm:$0xff] (!%p1268_p4)  }
  0xd1   : > { %1325 = vmatpush3.bf16.msra.mxu0 %v1507_v8  ;;  %1342 = vmatprep.subr.bf16.mxu1 (!%p1268_p4), %v1545_v43  ;;  %v1540_v53 = vld [vmem:[#allocation8 + $0x74] ss:$8 sps:$4 sm:$0xff] (!%p1268_p4)   ;;  %v1269_v54 = vld [vmem:[%s2209_s2] ss:$0 sm:$0xff] (!%p1268_p4)  ;;  %v1551_v56 = vld [vmem:[#allocation9 + $0x60] sm:$0xff] (!%p1268_p4)  }
  0xd2   : > { %1326 = vmatprep.subr.bf16.mxu0 %v1508_v9  ;;  %v1550_v55 = vld [vmem:[#allocation9 + $0x18] sm:$0xff] (!%p1268_p4)   ;;  %v1552_v58 = vld [vmem:[#allocation9 + $0x20] sm:$0xff] (!%p1268_p4)   ;;  %v1553_v61 = vld [vmem:[#allocation9 + $0x68] sm:$0xff] (!%p1268_p4)  }
  0xd3   : > { %v1542_v57 = vld [vmem:[#allocation8 + $0x70] ss:$8 sps:$4 sm:$0xff] (!%p1268_p4)   ;;  %v1554_v62 = vld [vmem:[#allocation9 + $0x28] sm:$0xff] (!%p1268_p4)   ;;  %v1559_v4 = vld [vmem:[#allocation11] sm:$0xff] (!%p1268_p4)  }
  0xd4   : > { %1343 = vmatpush3.bf16.msra.mxu1 (!%p1268_p4), %v1546_v44  ;;  %v1555_v0 = vld [vmem:[#allocation9 + $0x70] sm:$0xff] (!%p1268_p4)   ;;  %v1557_v2 = vld [vmem:[#allocation9 + $0x78] sm:$0xff] (!%p1268_p4)   ;;  %v1560_v6 = vld [vmem:[#allocation11 + $0x8] sm:$0xff] (!%p1268_p4)  }
  0xd5   : > { %1327 = vmatpush3.bf16.msra.mxu0 %v1509_v10  ;;  %1344 = vmatprep.subr.bf16.mxu1 (!%p1268_p4), %v1547_v45  ;;  %v1556_v1 = vld [vmem:[#allocation9 + $0x30] sm:$0xff] (!%p1268_p4)   ;;  %v1558_v3 = vld [vmem:[#allocation9 + $0x38] sm:$0xff] (!%p1268_p4)   ;;  %v1563_v9 = vld [vmem:[#allocation11 + $0x20] sm:$0xff] (!%p1268_p4)   ;;  %v676_v10 = vlaneseq (!%p1268_p4) }
  0xd6   : > { %1328 = vmatprep.subr.bf16.mxu0 %v1510_v11  ;;  %v1561_v7 = vld [vmem:[#allocation11 + $0x10] sm:$0xff] (!%p1268_p4)   ;;  %v1562_v8 = vld [vmem:[#allocation11 + $0x18] sm:$0xff] (!%p1268_p4)  }
  0xd7   : > { %v677_v11 = vshrl.u32 (!%p1268_p4), %v676_v10, 7 }
  0xd8   : > { %1345 = vmatpush3.bf16.msra.mxu1 (!%p1268_p4), %v1548_v48 }
  0xd9   : > { %1329 = vmatpush3.bf16.msra.mxu0 %v1511_v13  ;;  %1346 = vmatprep.subr.bf16.mxu1 (!%p1268_p4), %v1549_v49  ;;  %v678_v12 = vsub.s32 (!%p1268_p4), 0, %v677_v11  ;;  %v674_v13 = vld [vmem:[%s2211_s4] sm:$0x3] (!%p1268_p4) }
  0xda   : > { %1330 = vmatprep.subr.bf16.mxu0 %v1512_v14  ;;  %v682_v14 = vsub.s32 (!%p1268_p4), 1, %v677_v11 }
  0xdc   : > { %1347 = vmatpush3.bf16.msra.mxu1 (!%p1268_p4), %v1550_v55 }
  0xdd   : > { %1331 = vmatpush3.bf16.msra.mxu0 %v1513_v15  ;;  %1348 = vmatprep.subr.bf16.mxu1 (!%p1268_p4), %v1551_v56  ;;  %v679_v15 = vrot.slane (!%p1268_p4), %v674_v13, %v678_v12 }
  0xde   : > { %1332 = vmatprep.subr.bf16.mxu0 %v1514_v16 }
  0xe0   : > { %1349 = vmatpush3.bf16.msra.mxu1 (!%p1268_p4), %v1552_v58 }
  0xe1   : > { %1333 = vmatpush3.bf16.msra.mxu0 %v1515_v17  ;;  %1350 = vmatprep.subr.bf16.mxu1 (!%p1268_p4), %v1553_v61  ;;  %v683_v17 = vrot.slane (!%p1268_p4), %v674_v13, %v682_v14 }
  0xe2   : > { %766 = vmatprep.subr.bf16.mxu0 (!%p1268_p4), %v1519_v29  ;;  %v1566_v29 = vld [vmem:[#allocation11 + $0x38] sm:$0xff] (!%p1268_p4)  }
  0xe4   : > { %630 = vmatmul.mubr.bf16.vlgmr.msra.gmra.mrb[0].mxu0 %v1516_v18  ;;  %1351 = vmatpush3.bf16.msra.mxu1 (!%p1268_p4), %v1554_v62 }
  0xe5   : > { %798 = vmatprep.mubr.bf16.mxu0 (!%p1268_p4), %v1816_v31  ;;  %767 = vmatpush1.bf16.msra.mxu0 (!%p1268_p4), %v1521_v30  ;;  %v1286_v31 = vld [vmem:[%s2255_s9] ss:$0 sm:$0xff] (!%p1268_p4) }
  0xe6   : > { %768 = vmatprep.subr.bf16.mxu0 (!%p1268_p4), %v1522_v32  ;;  %1352 = vmatprep.subr.bf16.mxu1 (!%p1268_p4), %v1555_v0 }
  0xe8   : > { %1353 = vmatpush3.bf16.msra.mxu1 (!%p1268_p4), %v1556_v1 }
  0xe9   : > { %769 = vmatpush1.bf16.msra.mxu0 (!%p1268_p4), %v1524_v33  ;;  %1354 = vmatprep.subr.bf16.mxu1 (!%p1268_p4), %v1557_v2 }
  0xea   : > { %770 = vmatprep.subr.bf16.mxu0 (!%p1268_p4), %v1525_v34 }
  0xec   : > { %1355 = vmatpush3.bf16.msra.mxu1 (!%p1268_p4), %v1558_v3 }
  0xed   : > { %771 = vmatpush1.bf16.msra.mxu0 (!%p1268_p4), %v1527_v35 }
  0xee   : > { %772 = vmatprep.subr.bf16.mxu0 (!%p1268_p4), %v1528_v36 }
  0xf1   : > { %773 = vmatpush1.bf16.msra.mxu0 (!%p1268_p4), %v1530_v37 }
  0xf2   : > { %774 = vmatprep.subr.bf16.mxu0 (!%p1268_p4), %v1531_v38 }
  0xf5   : > { %775 = vmatpush1.bf16.msra.mxu0 (!%p1268_p4), %v1533_v40 }
  0xf6   : > { %776 = vmatprep.subr.bf16.mxu0 (!%p1268_p4), %v1534_v42  ;;  %v1303_v42 = vld [vmem:[%s2256_s16] ss:$0 sm:$0xff] (!%p1268_p4) }
  0xf9   : > { %777 = vmatpush1.bf16.msra.mxu0 (!%p1268_p4), %v1536_v46 }
  0xfa   : > { %778 = vmatprep.subr.bf16.mxu0 (!%p1268_p4), %v1537_v47 }
  0xfd   : > { %779 = vmatpush1.bf16.msra.mxu0 (!%p1268_p4), %v1539_v50 }
  0xfe   : > { %780 = vmatprep.subr.bf16.mxu0 (!%p1268_p4), %v1540_v53 }
 0x101   : > { %781 = vmatpush1.bf16.msra.mxu0 (!%p1268_p4), %v1542_v57 }
 0x102   : > { %1371 = vmatprep.subr.bf16.mxu0 (!%p1268_p4), %v1817_v5 }
 0x1b7   : > { %v1334_v19 = vpop.f32.mrb[0].mxu0 }
 0x1b8   : > { %v1335_v21 = vpop.f32.mrb[1].mxu0 }
 0x1b9   : > { %v1336_v22 = vadd.f32 %v1335_v21, %v1334_v19  ;;  %v1337_v23 = vpop.f32.mrb[2].mxu0  ;;  %645 = sbr.rel (%p1268_p4) target bundleno = 1119 (0x45f), region = 84 }
 0x1ba   : > { %v1338_v25 = vpop.f32.mrb[3].mxu0 }
 0x1bb   : > { %v638_v26 = vadd.f32 %v1336_v22, %v455_v20  ;;  %v1339_v27 = vadd.f32 %v1338_v25, %v1337_v23 }
 0x1bd   : > { %640 = vst [vmem:[#allocation2] sm:$0xff] %v638_v26  ;;  %v639_v28 = vadd.f32 %v1339_v27, %v456_v24  ;;  %v1564_v27 = vld [vmem:[#allocation11 + $0x28] sm:$0xff] (!%p1268_p4)  }
 0x1bf   : > { %641 = vst [vmem:[#allocation2 + $0x8] sm:$0xff] %v639_v28  ;;  %v1565_v28 = vld [vmem:[#allocation11 + $0x30] sm:$0xff] (!%p1268_p4)  }
 0x1c4   : > { %v646_v51 = vld [vmem:[#allocation2] sm:$0xff] }
 0x1c5   : > { %v655_v59 = vadd.f32 %v1269_v54, %v646_v51 }
 0x1c6   : > { %v647_v52 = vld [vmem:[#allocation2 + $0x8] sm:$0xff] }
 0x1c7   : > { %v656_v60 = vadd.f32 %v1269_v54, %v647_v52 }
 0x1c9   : > { %v657_v63 = vpack.c.bf16 %v656_v60, %v655_v59 }
 0x1cb   : > { %799 = vmatmul.mubr.bf16.vlgmr.msra.gmra.mrb[0].mxu0 %v657_v63 }
 0x1cc   : > { %1372 = vmatpush3.bf16.msra.mxu0 %v1559_v4  ;;  %1387 = vmatprep.mubr.msk.bf16.mxu0 %vm1818_vm0, %v1817_v5 }
 0x1cd   : > { %1373 = vmatprep.subr.bf16.mxu0 %v1817_v5 }
 0x1d0   : > { %1374 = vmatpush3.bf16.msra.mxu0 %v1560_v6 }
 0x1d1   : > { %1375 = vmatprep.subr.bf16.mxu0 %v1817_v5 }
 0x1d4   : > { %1376 = vmatpush3.bf16.msra.mxu0 %v1561_v7 }
 0x1d5   : > { %1377 = vmatprep.subr.bf16.mxu0 %v1817_v5 }
 0x1d8   : > { %1378 = vmatpush3.bf16.msra.mxu0 %v1562_v8 }
 0x1d9   : > { %1379 = vmatprep.subr.bf16.mxu0 %v1817_v5 }
 0x1dc   : > { %1380 = vmatpush3.bf16.msra.mxu0 %v1563_v9 }
 0x1dd   : > { %1381 = vmatprep.subr.bf16.mxu0 %v1817_v5 }
 0x1e0   : > { %1382 = vmatpush3.bf16.msra.mxu0 %v1564_v27 }
 0x1e1   : > { %1383 = vmatprep.subr.bf16.mxu0 %v1817_v5 }
 0x1e4   : > { %1384 = vmatpush3.bf16.msra.mxu0 %v1565_v28 }
 0x1e5   : > { %1385 = vmatprep.subr.bf16.mxu0 %v1817_v5 }
 0x1e8   : > { %1386 = vmatpush3.bf16.msra.mxu0 %v1566_v29 }
 0x29e   : > { %v800_v16 = vpop.f32.mrb[0].mxu0 }
 0x29f   : > { %v802_v18 = vpop.f32.mrb[1].mxu0  ;;  %v801_v20 = vadd.f32 %v800_v16, %v679_v15 }
 0x2a0   : > { %v804_v19 = vpop.f32.mrb[2].mxu0  ;;  %v803_v23 = vadd.f32 %v802_v18, %v683_v17 }
 0x2a1   : > { %v805_v21 = vadd.f32 %v804_v19, %v679_v15  ;;  %v806_v22 = vpop.f32.mrb[3].mxu0 }
 0x2a2   : > { %v807_v24 = vadd.f32 %v806_v22, %v683_v17 }
 0x2a3   : > { %v809_v25 = vpack.c.bf16 %v805_v21, %v801_v20 }
 0x2a4   : > { %v810_v26 = vpack.c.bf16 %v807_v24, %v803_v23 }
 0x2a6   : > { %978 = vmatprep.mubr.bf16.mxu1 %v810_v26 }
 0x2a7   : > { %979 = vmatmul.mubr.bf16.vlgmr.msra.gmra.mrb[0].mxu1 %v809_v25 }
 0x37a   : > { %v1356_v30 = vpop.f32.mrb[0].mxu1 }
 0x37b   : > { %v1357_v32 = vpop.f32.mrb[1].mxu1 }
 0x37c   : > { %v1358_v33 = vadd.f32 %v1357_v32, %v1356_v30  ;;  %v1359_v34 = vpop.f32.mrb[2].mxu1 }
 0x37d   : > { %v1360_v35 = vpop.f32.mrb[3].mxu1 }
 0x37e   : > { %v981_v36 = vadd.f32 %v1358_v33, %v1286_v31  ;;  %v1361_v37 = vadd.f32 %v1360_v35, %v1359_v34 }
 0x380   : > { %v984_v38 = vadd.f32 %v1361_v37, %v1286_v31  ;;  %v987_v39 = vmax.f32 %v981_v36, 0.0 }
 0x382   : > { %v988_v40 = vmax.f32 %v984_v38, 0.0 }
 0x384   : > { %v989_v41 = vpack.c.bf16 %v988_v40, %v987_v39 }
 0x386   : > { %1388 = vmatmul.mubr.bf16.vlgmr.msra.gmra.mrb[4].mxu0 %v989_v41 }
 0x459   : > { %v1095_v43 = vpop.f32.mrb[4].mxu0 }
 0x45a   : > { %v1096_v44 = vadd.f32 %v1303_v42, %v1095_v43  ;;  %v1389_v45 = vpop.f32.mrb[5].mxu0 }
 0x45b   : > { %v1098_v46 = vpop.f32.mrb[6].mxu0 }
 0x45c   : > { %1102 = vst [vmem:[#allocation12] sm:$0xff] %v1096_v44  ;;  %v1099_v47 = vadd.f32 %v1303_v42, %v1098_v46  ;;  %v1390_v48 = vpop.f32.mrb[7].mxu0 }
 0x45e   : > { %1103 = vst [vmem:[#allocation12 + $0x8] sm:$0xff] %v1099_v47 }
 0x45f PF: > { %p1435_p7 = scmp.eq.s32.totalorder %s1901_s15, 2  ;;  %s1819_s28 = smov [#allocation12]  }
 0x460   : > { %s1113_s7 = sshll.u32 %s1819_s28, 4  ;;  %s1114_s7 = int_to_ptr.vmem [resolvable:$true] %s1113_s7 }
 0x461   : > { %s1711_s29 = scalar_lea.vmem %s1114_s7, 256  ;;  %p1718_p1 = scmp.lt.s32.totalorder %s1114_s7, %s1114_s7 }
 0x462   : > { %p1712_p9 = scmp.ne.s32.totalorder %s1114_s7, %s1711_s29  ;;  %p1719_p3 = scmp.lt.s32.totalorder %s1711_s29, %s1711_s29 }
 0x464   : > { %p1713_p5 = pnand %p1712_p9, %p1435_p7  ;;  %p1720_p2 = por %p1719_p3, %p1718_p1 }
 0x466   : > { %p1714_p10 = pneg %p1713_p5 }
 0x468   : > { %p1721_p13 = pnand %p1720_p2, %p1714_p10 }
 0x46a   : > { %1724 = shalt.err (!%p1721_p13)
}
 0x46b   : > { %s2257_s8 = sld [smem:[#allocation24_spill]] }
 0x471   : > { %s1725_s27 = scalar_lea.hbm %s2257_s8, 256 }
 0x472   : > { %p1726_p0 = scmp.ne.s32.totalorder %s2257_s8, %s1725_s27  ;;  %p1731_p11 = scmp.lt.u32.totalorder %s1725_s27, %s2257_s8 }
 0x474   : > { %p1727_p6 = pnand %p1726_p0, %p1435_p7 }
 0x476   : > { %p1728_p8 = pneg %p1727_p6 }
 0x478   : > { %p1733_p12 = pnand %p1731_p11, %p1728_p8 }
 0x47a   : > { %1736 = shalt.err (!%p1733_p12)
}
 0x47b   : > { %s1820_s12 = smov 128   ;;  %s1821_s17 = smov 8  }
 0x47c   : > { %1408 = dma.vmem_to_hbm [thread:$0]  (%p1435_p7), %s1114_s7, 256, %s2257_s8, [#allocation5], %s1820_s12, %s1820_s12, %s1821_s17  }
 0x47d   : > { %1778 = dma.done.wait (%p1435_p7), [#allocation5], 256  }
 0x47e   : > { %1780 = vsyncadd (%p1435_p7), [#allocation5], 4294967040 }
 0x47f PF: > { %s27_s14 = sadd.s32 1, %s1803_s14   ;;  %s2258_s25 = smov %s2265_s30 }
 0x480   : > { %p24_p4 = scmp.ge.s32.totalorder %s27_s14, 5   ;;  %s2259_s30 = smov %s1787_s10 }
 0x481   : > { %s2260_s10 = smov %s1791_s11  ;;  %s2261_s11 = smov %s2038_s3 }
 0x482   : > { %s2262_s12 = smov %s1799_s13  ;;  %s2263_s13 = smov %s2258_s25 }
 0x483   :  { %26 = sbr.rel (!%p24_p4) target bundleno = 16 (0x10), region = 127 }
 0x48a   :  { %1129 = vsyncpa [#allocation4], 1 }
 0x48b   :  { %1131 = vsyncpa [#allocation4 + $0x1], 1 }
 0x48c   :  { %1132 = vsyncpa [#allocation7], 1 }
 0x48d   :  { %1134 = vsyncpa [#allocation7 + $0x1], 1 }
 0x48e   :  { %1135 = vsyncpa [#allocation10], 1 }
 0x48f   :  { %1136 = vsyncpa [#allocation5], 1 }
 0x490   :  { %1138 = vsyncpa [#allocation5 + $0x1], 1 }

</bundles_post_ra>
